<compile_context>
chip_gen: v5e
topology: v5e:2x2
jax: 0.10.0
libtpu: 0.0.40
codegen_flags: <defaults>
</compile_context>

<pallas_src>
import functools
import numpy as np

import jax
import jax.numpy as jnp
from jax.experimental import pallas as pl
from jax.experimental.pallas import tpu as pltpu


# ----------------------------------------------------------------------------
# helpers
# ----------------------------------------------------------------------------
def _round_up(x, m):
    return (x + m - 1) // m * m


def _pick_div(d, max_tile):
    for c in (512, 256, 128, 64, 32, 16, 8):
        if c <= max_tile and c <= d and d % c == 0:
            return c
    return None


_SQRT1_2 = 0.7071067811865476


def _erf_poly(x):
    # Abramowitz & Stegun 7.1.26 (|err| <= 1.5e-7 == f32 noise level): keeps
    # exact-GELU semantics without relying on an erf lowering inside Mosaic.
    ax = jnp.abs(x)
    t = 1.0 / (1.0 + 0.3275911 * ax)
    poly = t * (0.254829592 + t * (-0.284496736 + t * (1.421413741 +
                t * (-1.453152027 + t * 1.061405429))))
    y = 1.0 - poly * jnp.exp(-ax * ax)
    return jnp.where(x >= 0.0, y, -y)


def _gelu(x):
    return 0.5 * x * (1.0 + _erf_poly(x * _SQRT1_2))


# ----------------------------------------------------------------------------
# Pallas kernel: fused (LayerNorm) -> matmul -> bias (+ReLU/GELU) (+residual)
# ----------------------------------------------------------------------------
def _make_linear_kernel(activation, fuse_ln, has_res):
    def kernel(*refs):
        a_ref, b_ref, bias_ref = refs[0], refs[1], refs[2]
        idx = 3
        if fuse_ln:
            g_ref, be_ref = refs[idx], refs[idx + 1]
            idx += 2
        if has_res:
            res_ref = refs[idx]
            idx += 1
        o_ref, acc_ref = refs[idx], refs[idx + 1]

        @pl.when(pl.program_id(2) == 0)
        def _():
            acc_ref[...] = jnp.zeros_like(acc_ref)

        a = a_ref[...]
        if fuse_ln:
            # LayerNorm over the full feature dim (tk == K), eps = 1e-5.
            a = a.astype(jnp.float32)
            mu = jnp.mean(a, axis=-1, keepdims=True)
            xc = a - mu
            var = jnp.mean(xc * xc, axis=-1, keepdims=True)
            a = xc * jax.lax.rsqrt(var + 1e-5) * g_ref[...] + be_ref[...]

        acc_ref[...] += jnp.dot(a.astype(jnp.bfloat16),
                                b_ref[...].astype(jnp.bfloat16),
                                preferred_element_type=jnp.float32)

        @pl.when(pl.program_id(2) == pl.num_programs(2) - 1)
        def _():
            r = acc_ref[...] + bias_ref[...]
            if activation == "relu":
                r = jnp.maximum(r, 0.0)
            elif activation == "gelu":
                r = _gelu(r)
            if has_res:
                r = r + res_ref[...].astype(jnp.float32)
            o_ref[...] = r.astype(o_ref.dtype)

    return kernel


@functools.partial(jax.jit, static_argnames=("activation", "out_dtype"))
def _pallas_linear_impl(a, b, bias, gamma, beta, residual, activation, out_dtype):
    M, K = a.shape
    K2, N = b.shape
    assert K == K2
    fuse_ln = gamma is not None
    has_res = residual is not None
    odt = jnp.dtype(out_dtype)

    # ---- K tiling (full K when LayerNorm is fused) ----
    if fuse_ln:
        assert K <= 1024, "LN fusion needs the full feature dim in one K block"
        tk, Kp = K, K
    else:
        tk = _pick_div(K, 512)
        if tk is None:
            Kp = _round_up(K, 128)
            tk = min(512, Kp)
            Kp = _round_up(Kp, tk)
        else:
            Kp = K

    # ---- N tiling: single block when LN is fused (LN computed exactly once) ----
    if fuse_ln:
        assert N <= 2048
        tn, Np = N, N
    else:
        tn = _pick_div(N, 512)
        if tn is None:
            Np = _round_up(N, 128)
            tn = min(512, Np)
            Np = _round_up(Np, tn)
        else:
            Np = N

    # ---- M tiling from a VMEM budget (double-buffered in/out + f32 acc) ----
    a_bytes = a.dtype.itemsize
    b_bytes = b.dtype.itemsize
    res_bytes = residual.dtype.itemsize if has_res else 0
    out_bytes = odt.itemsize
    budget = 8 * 1024 * 1024

    def vmem_cost(tm_):
        return (2 * tm_ * tk * a_bytes + 2 * tk * tn * b_bytes
                + 2 * tm_ * tn * out_bytes + tm_ * tn * 4
                + 2 * tm_ * tn * res_bytes + 4 * tn * 4)

    tm, Mp = None, M
    for cand in (512, 256, 128, 64, 32, 16, 8):
        if M % cand == 0 and vmem_cost(cand) <= budget:
            tm = cand
            break
    if tm is None:
        Mp0 = _round_up(M, 8)
        tm = 8
        for cand in (512, 256, 128, 64, 32, 16, 8):
            if cand <= Mp0 and vmem_cost(cand) <= budget:
                tm = cand
                break
        Mp = _round_up(Mp0, tm)

    # give the second TensorCore (v7x) at least 2 blocks when trivially possible
    if (Mp // tm) * (Np // tn) == 1 and tm >= 16 and tm % 2 == 0:
        tm //= 2

    a_p = a if (Mp == M and Kp == K) else jnp.pad(a, ((0, Mp - M), (0, Kp - K)))
    b_p = b if (Kp == K and Np == N) else jnp.pad(b, ((0, Kp - K), (0, Np - N)))
    bias_p = (bias if Np == N else jnp.pad(bias, (0, Np - N)))
    bias_p = bias_p.reshape(1, Np).astype(jnp.float32)

    in_specs = [pl.BlockSpec((tm, tk), lambda i, j, k: (i, k)),
                pl.BlockSpec((tk, tn), lambda i, j, k: (k, j)),
                pl.BlockSpec((1, tn), lambda i, j, k: (0, j))]
    args = [a_p, b_p, bias_p]
    if fuse_ln:
        in_specs += [pl.BlockSpec((1, tk), lambda i, j, k: (0, k)),
                     pl.BlockSpec((1, tk), lambda i, j, k: (0, k))]
        args += [gamma.reshape(1, K).astype(jnp.float32),
                 beta.reshape(1, K).astype(jnp.float32)]
    if has_res:
        res_p = residual
        if Mp != M or Np != N:
            res_p = jnp.pad(residual, ((0, Mp - M), (0, Np - N)))
        in_specs.append(pl.BlockSpec((tm, tn), lambda i, j, k: (i, j)))
        args.append(res_p)

    out = pl.pallas_call(
        _make_linear_kernel(activation, fuse_ln, has_res),
        out_shape=jax.ShapeDtypeStruct((Mp, Np), odt),
        grid=(Mp // tm, Np // tn, Kp // tk),
        in_specs=in_specs,
        out_specs=pl.BlockSpec((tm, tn), lambda i, j, k: (i, j)),
        scratch_shapes=[pltpu.VMEM((tm, tn), jnp.float32)],
        compiler_params=pltpu.CompilerParams(
            dimension_semantics=("parallel", "parallel", "arbitrary"),
            vmem_limit_bytes=32 * 1024 * 1024),
    )(*args)

    if Mp != M or Np != N:
        out = out[:M, :N]
    return out


def pallas_linear(a, b, bias=None, activation="none", ln=None, residual=None,
                  out_dtype=jnp.float32):
    """a: (M, K) activations, b: (K, N) bf16 weights.
    Optional fused LayerNorm on `a`, bias, ReLU/exact-GELU and residual add."""
    N = b.shape[1]
    if bias is None:
        bias = jnp.zeros((N,), jnp.float32)
    gamma, beta = ln if ln is not None else (None, None)
    return _pallas_linear_impl(a, b, bias, gamma, beta, residual, activation,
                               jnp.dtype(out_dtype).name)


# ----------------------------------------------------------------------------
# Pallas kernel: 3x3 conv (stride 1, pad 1, no bias)
#   single padded HBM input, double-buffered (th+2)-row halo DMA,
#   taps merged to K = 3*Cin matmuls, optional fused ReLU / residual add.
# ----------------------------------------------------------------------------
def _make_conv3x3_kernel(th, W, Cin, Cout, relu, has_res, merge, nb, ni):
    def kernel(*refs):
        if has_res:
            x_hbm, w_ref, res_ref, o_ref, xbuf, sem = refs
        else:
            x_hbm, w_ref, o_ref, xbuf, sem = refs

        b = pl.program_id(0)
        i = pl.program_id(1)
        step = b * ni + i
        total = nb * ni

        def issue(bb, ii, slot):
            pltpu.make_async_copy(x_hbm.at[bb, pl.ds(ii * th, th + 2)],
                                  xbuf.at[slot], sem.at[slot]).start()

        @pl.when(step == 0)
        def _():
            issue(b, i, 0)

        @pl.when(step + 1 < total)
        def _():
            nstep = step + 1
            issue(nstep // ni, nstep % ni, nstep % 2)

        slot = step % 2
        pltpu.make_async_copy(x_hbm.at[0, pl.ds(0, th + 2)],
                              xbuf.at[slot], sem.at[slot]).wait()

        x = xbuf[slot].astype(jnp.bfloat16)              # (th+2, W+2, Cin)
        acc = jnp.zeros((th * W, Cout), jnp.float32)
        if merge:
            for dy in range(3):
                strip = x[dy:dy + th]                    # (th, W+2, Cin)
                cat = jnp.concatenate([strip[:, 0:W, :],
                                       strip[:, 1:W + 1, :],
                                       strip[:, 2:W + 2, :]], axis=-1)
                acc = acc + jnp.dot(cat.reshape(th * W, 3 * Cin), w_ref[dy],
                                    preferred_element_type=jnp.float32)
        else:
            # tiny-Cin path (head/tail convs): per-tap matmuls
            for dy in range(3):
                for dx in range(3):
                    patch = x[dy:dy + th, dx:dx + W, :].reshape(th * W, Cin)
                    acc = acc + jnp.dot(
                        patch, w_ref[dy, dx * Cin:(dx + 1) * Cin, :],
                        preferred_element_type=jnp.float32)

        if relu:
            acc = jnp.maximum(acc, 0.0)
        acc = acc.reshape(1, th, W, Cout)
        if has_res:
            acc = acc + res_ref[...]
        o_ref[...] = acc

    return kernel


def pallas_conv3x3(x, w, relu=False, residual=None):
    return _pallas_conv3x3_impl(x, w, residual, relu)


@functools.partial(jax.jit, static_argnames=("relu",))
def _pallas_conv3x3_impl(x, w, residual, relu):
    """x: (B, H, W, Cin), w: (3, 3, Cin, Cout) bf16 -> (B, H, W, Cout) f32."""
    B, H, W, Cin = x.shape
    Cout = w.shape[-1]
    has_res = residual is not None
    w3 = w.reshape(3, 3 * Cin, Cout).astype(jnp.bfloat16)
    xp = jnp.pad(x, ((0, 0), (1, 1), (1, 1), (0, 0)))

    # tile height derived from a VMEM budget
    budget = 8 * 1024 * 1024
    th = 1
    for cand in (128, 64, 32, 16, 8, 4, 2, 1):
        if H % cand:
            continue
        cost = (2 * (cand + 2) * (W + 2) * Cin * 4
                + (2 + (2 if has_res else 0)) * cand * W * Cout * 4
                + cand * W * 3 * Cin * 2
                + 9 * Cin * Cout * 2)
        if cost <= budget:
            th = cand
            break

    merge = (Cin % 8 == 0)
    nb, ni = B, H // th
    in_specs = [pl.BlockSpec(memory_space=pl.ANY),
                pl.BlockSpec((3, 3 * Cin, Cout), lambda b, i: (0, 0, 0))]
    args = [xp, w3]
    if has_res:
        in_specs.append(pl.BlockSpec((1, th, W, Cout), lambda b, i: (b, i, 0, 0)))
        args.append(residual)

    return pl.pallas_call(
        _make_conv3x3_kernel(th, W, Cin, Cout, relu, has_res, merge, nb, ni),
        out_shape=jax.ShapeDtypeStruct((B, H, W, Cout), jnp.float32),
        grid=(nb, ni),
        in_specs=in_specs,
        out_specs=pl.BlockSpec((1, th, W, Cout), lambda b, i: (b, i, 0, 0)),
        scratch_shapes=[pltpu.VMEM((2, th + 2, W + 2, Cin), jnp.float32),
                        pltpu.SemaphoreType.DMA((2,))],
        compiler_params=pltpu.CompilerParams(
            dimension_semantics=("arbitrary", "arbitrary"),
            vmem_limit_bytes=32 * 1024 * 1024),
    )(*args)


# ----------------------------------------------------------------------------
# Pallas kernel: window multi-head self-attention (head-major q/k/v layout,
# scale pre-folded into the qkv weights, batched windows x heads per step)
# ----------------------------------------------------------------------------
def _make_attn_kernel(wb, heads, WA, hd, has_mask):
    def kernel(*refs):
        if has_mask:
            q_ref, k_ref, v_ref, rel_ref, mask_ref, o_ref = refs
        else:
            q_ref, k_ref, v_ref, rel_ref, o_ref = refs
        bh = wb * heads
        q = q_ref[0].reshape(bh, WA, hd).astype(jnp.bfloat16)
        k = k_ref[0].reshape(bh, WA, hd).astype(jnp.bfloat16)
        v = v_ref[0].reshape(bh, WA, hd).astype(jnp.bfloat16)
        s = jnp.einsum("bqd,bkd->bqk", q, k, preferred_element_type=jnp.float32)
        s = s.reshape(wb, heads, WA, WA) + rel_ref[...][None]
        if has_mask:
            s = s + mask_ref[...][:, None]
        s = s - jnp.max(s, axis=-1, keepdims=True)
        p = jnp.exp(s)
        p = p * pl.reciprocal(jnp.sum(p, axis=-1, keepdims=True), approx=True)
        o = jnp.einsum("bqk,bkd->bqd",
                       p.reshape(bh, WA, WA).astype(jnp.bfloat16), v,
                       preferred_element_type=jnp.float32)
        o_ref[...] = o.reshape(wb, heads, WA, hd).astype(o_ref.dtype)

    return kernel


def pallas_window_attention(qkv, rel, mask, BW, nW, WA, heads, head_dim):
    return _pallas_attn_impl(qkv, rel, mask, BW, nW, WA, heads, head_dim)


@functools.partial(jax.jit,
                   static_argnames=("BW", "nW", "WA", "heads", "head_dim"))
def _pallas_attn_impl(qkv, rel, mask, BW, nW, WA, heads, head_dim):
    """qkv: (3, BW, heads, WA, hd) bf16 (Q pre-scaled), rel: (heads, WA, WA),
       mask: None or (nW, WA, WA) additive.  Returns (BW, heads, WA, hd) bf16."""
    hd = head_dim
    has_mask = mask is not None

    # windows-per-step from a VMEM budget; keep >= 2 grid blocks when possible
    per_win = (6 * heads * WA * hd * 2 + 3 * heads * WA * WA * 4
               + (2 * WA * WA * 4 if has_mask else 0) + 2 * heads * WA * hd * 2)
    budget = 4 * 1024 * 1024
    wb = 1
    for cand in (64, 32, 16, 8, 4, 2):
        if nW % cand == 0 and cand * per_win <= budget:
            wb = cand
            break
    while wb > 1 and BW // wb < 2:
        wb //= 2
    nblk = max(nW // wb, 1)

    in_specs = [pl.BlockSpec((1, wb, heads, WA, hd), lambda i: (0, i, 0, 0, 0)),
                pl.BlockSpec((1, wb, heads, WA, hd), lambda i: (1, i, 0, 0, 0)),
                pl.BlockSpec((1, wb, heads, WA, hd), lambda i: (2, i, 0, 0, 0)),
                pl.BlockSpec((heads, WA, WA), lambda i: (0, 0, 0))]
    args = [qkv, qkv, qkv, rel]
    if has_mask:
        in_specs.append(pl.BlockSpec((wb, WA, WA), lambda i: (i % nblk, 0, 0)))
        args.append(mask)

    return pl.pallas_call(
        _make_attn_kernel(wb, heads, WA, hd, has_mask),
        out_shape=jax.ShapeDtypeStruct((BW, heads, WA, hd), jnp.bfloat16),
        grid=(BW // wb,),
        in_specs=in_specs,
        out_specs=pl.BlockSpec((wb, heads, WA, hd), lambda i: (i, 0, 0, 0)),
        compiler_params=pltpu.CompilerParams(
            dimension_semantics=("parallel",),
            vmem_limit_bytes=32 * 1024 * 1024),
    )(*args)


# ----------------------------------------------------------------------------
# Pallas kernels: wrapper elementwise pre-scale / final clamp (lane-dense)
# ----------------------------------------------------------------------------
def _make_elementwise_kernel(which):
    def kernel(x_ref, o_ref):
        x = x_ref[...]
        if which == "prescale":
            o_ref[...] = jnp.where(x > 1.0, x * (1.0 / 255.0), x)
        else:
            o_ref[...] = jnp.clip(x, 0.0, 1.0)

    return kernel


@functools.partial(jax.jit, static_argnames=("which",))
def pallas_elementwise(x, which):
    shp = x.shape
    flat = x.reshape(-1)
    n = flat.shape[0]
    width = 1024
    rows = max(1, -(-n // width))
    rows_p = _round_up(rows, 8)
    tr = 8
    for cand in (256, 128, 64, 32, 16, 8):
        if rows_p % cand == 0:
            tr = cand
            break
    flat = jnp.pad(flat, (0, rows_p * width - n)).reshape(rows_p, width)
    out = pl.pallas_call(
        _make_elementwise_kernel(which),
        out_shape=jax.ShapeDtypeStruct((rows_p, width), jnp.float32),
        grid=(rows_p // tr,),
        in_specs=[pl.BlockSpec((tr, width), lambda i: (i, 0))],
        out_specs=pl.BlockSpec((tr, width), lambda i: (i, 0)),
        compiler_params=pltpu.CompilerParams(dimension_semantics=("parallel",)),
    )(flat)
    return out.reshape(-1)[:n].reshape(shp)


# ----------------------------------------------------------------------------
# stride-2 down/up sampling (pointwise matmul on rearranged pixels)
# TODO(synk): express the 2x2 subpixel rearrangement directly in BlockSpec
# index maps to avoid the XLA transpose materialization around the matmul.
# ----------------------------------------------------------------------------
def conv2x2_down(x, w):
    # stride 2, no bias.  w: (2, 2, Cin, Cout) bf16
    B, H, W, C = x.shape
    xr = x.reshape(B, H // 2, 2, W // 2, 2, C).transpose(0, 1, 3, 2, 4, 5)
    y = pallas_linear(xr.reshape(-1, 4 * C), w.reshape(4 * C, -1))
    return y.reshape(B, H // 2, W // 2, -1)


def convT2x2_up(x, w):
    # ConvTranspose2d(k=2, s=2), no bias.  w: (Cin, 2, 2, Cout) bf16
    B, H, W, C = x.shape
    Cout = w.shape[-1]
    y = pallas_linear(x.reshape(-1, C), w.reshape(C, 4 * Cout))
    y = y.reshape(B, H, W, 2, 2, Cout).transpose(0, 1, 3, 2, 4, 5)
    return y.reshape(B, 2 * H, 2 * W, Cout)


# ----------------------------------------------------------------------------
# WMSA / Block / ConvTransBlock forward (matching the PyTorch reference)
# ----------------------------------------------------------------------------
@functools.lru_cache(maxsize=None)
def _sw_mask(nW, WA, s_len):
    # ONNX-friendly reference mask: only the last window index is masked.
    m = np.zeros((nW, WA, WA), dtype=np.float32)
    m[nW - 1, :s_len, s_len:] = -np.inf
    m[nW - 1, s_len:, :s_len] = -np.inf
    return jnp.asarray(m)


def block_forward(x, p, head_dim, window_size, wtype):
    b, h, w, c = x.shape
    ws = window_size
    heads = c // head_dim
    shift = ws // 2
    hW, wW = h // ws, w // ws
    nW, WA = hW * wW, ws * ws

    xr = x if wtype == "W" else jnp.roll(x, shift=(-shift, -shift), axis=(1, 2))
    xw = xr.reshape(b, hW, ws, wW, ws, c).transpose(0, 1, 3, 2, 4, 5)
    xw = xw.reshape(b * nW * WA, c)

    # LayerNorm(ln1) fused into the qkv projection; 1/sqrt(d) folded into Q
    # weights at setup; qkv emitted as bf16 (feeds MXU matmuls only).
    qkv = pallas_linear(xw, p["msa"]["qkv_w"], bias=p["msa"]["qkv_b"],
                        ln=(p["ln1_w"], p["ln1_b"]), out_dtype=jnp.bfloat16)
    qkv = qkv.reshape(b * nW, WA, 3, heads, head_dim).transpose(2, 0, 3, 1, 4)

    mask = None
    if wtype != "W":
        mask = _sw_mask(nW, WA, ws - shift)

    attn = pallas_window_attention(qkv, p["msa"]["rel"], mask,
                                   b * nW, nW, WA, heads, head_dim)
    attn = attn.transpose(0, 2, 1, 3).reshape(b * nW * WA, c)

    # output projection; residual add fused when it commutes exactly (b == 1)
    res_in = xw if b == 1 else None
    y = pallas_linear(attn, p["msa"]["proj_w"], bias=p["msa"]["proj_b"],
                      residual=res_in)
    y = y.reshape(b, nW, WA, c).transpose(1, 0, 2, 3)           # reference quirk
    y = y.reshape(b, hW, wW, ws, ws, c).transpose(0, 1, 3, 2, 4, 5)
    y = y.reshape(b, h, w, c)
    if wtype != "W":
        y = jnp.roll(y, shift=(shift, shift), axis=(1, 2))
    if b != 1:
        y = x + y
    x = y                                                        # x + MSA(ln1(x))

    # MLP: LN2 + W1 + exact GELU fused (hidden stored bf16), residual fused in W2
    xf = x.reshape(-1, c)
    hid = pallas_linear(xf, p["mlp_w1"], bias=p["mlp_b1"],
                        ln=(p["ln2_w"], p["ln2_b"]), activation="gelu",
                        out_dtype=jnp.bfloat16)
    out = pallas_linear(hid, p["mlp_w2"], bias=p["mlp_b2"], residual=xf)
    return out.reshape(b, h, w, c)


def conv_trans_block_forward(x, p, conv_dim, trans_dim, head_dim, window_size,
                             input_resolution):
    wtype = p["type"]
    if input_resolution <= window_size:
        wtype = "W"
    B, H, W, C = x.shape
    x_flat = x.reshape(-1, C)

    y = pallas_linear(x_flat, p["conv1_1_w"], bias=p["conv1_1_b"])
    y = y.reshape(B, H, W, C)
    conv_x, trans_x = y[..., :conv_dim], y[..., conv_dim:]

    c1 = pallas_conv3x3(conv_x, p["cb_w1"], relu=True)        # conv + fused ReLU
    conv_x = pallas_conv3x3(c1, p["cb_w2"], relu=False, residual=conv_x)

    trans_x = block_forward(trans_x, p["trans"], head_dim, window_size, wtype)

    cat = jnp.concatenate([conv_x, trans_x], axis=-1).reshape(-1, C)
    res = pallas_linear(cat, p["conv1_2_w"], bias=p["conv1_2_b"],
                        residual=x_flat)                       # x + conv1_2(cat)
    return res.reshape(B, H, W, C)


# ----------------------------------------------------------------------------
# parameter construction (deterministic, in-script; matmul weights in bf16)
# ----------------------------------------------------------------------------
_PKEY = jax.random.PRNGKey(0)
_PCOUNT = [0]


def _w_init_f32(shape):
    _PCOUNT[0] += 1
    return 0.02 * jax.random.normal(jax.random.fold_in(_PKEY, _PCOUNT[0]),
                                    shape, dtype=jnp.float32)


def _w_init(shape):
    return _w_init_f32(shape).astype(jnp.bfloat16)


def _relative_embedding_np(rel_pos_np, ws):
    coords = np.stack(np.meshgrid(np.arange(ws), np.arange(ws), indexing="ij"))
    coords = coords.reshape(2, -1).T                              # (WA, 2)
    rc = coords[:, None, :] - coords[None, :, :] + ws - 1         # (WA, WA, 2)
    return rel_pos_np[:, rc[..., 0], rc[..., 1]]                  # (heads, WA, WA)


def make_trans_block_params(c, head_dim, window_size=8):
    heads = c // head_dim
    ws = window_size
    scale = float(head_dim) ** (-0.5)
    qkv_w = _w_init_f32((c, 3 * c))
    qkv_w = qkv_w.at[:, :c].multiply(scale)                  # fold 1/sqrt(d) into Q
    qkv_b = jnp.zeros((3 * c,), jnp.float32).at[:c].multiply(scale)
    rel_raw = np.asarray(_w_init_f32((heads, 2 * ws - 1, 2 * ws - 1)))
    rel = jnp.asarray(_relative_embedding_np(rel_raw, ws), jnp.float32)
    return {
        "ln1_w": jnp.ones((c,), jnp.float32), "ln1_b": jnp.zeros((c,), jnp.float32),
        "msa": {
            "qkv_w": qkv_w.astype(jnp.bfloat16), "qkv_b": qkv_b,
            "rel": rel,
            "proj_w": _w_init((c, c)), "proj_b": jnp.zeros((c,), jnp.float32),
        },
        "ln2_w": jnp.ones((c,), jnp.float32), "ln2_b": jnp.zeros((c,), jnp.float32),
        "mlp_w1": _w_init((c, 4 * c)), "mlp_b1": jnp.zeros((4 * c,), jnp.float32),
        "mlp_w2": _w_init((4 * c, c)), "mlp_b2": jnp.zeros((c,), jnp.float32),
    }


def make_ctb_params(conv_dim, trans_dim, head_dim, wtype):
    C = conv_dim + trans_dim
    return {
        "type": wtype,
        "conv1_1_w": _w_init((C, C)), "conv1_1_b": jnp.zeros((C,), jnp.float32),
        "conv1_2_w": _w_init((C, C)), "conv1_2_b": jnp.zeros((C,), jnp.float32),
        "cb_w1": _w_init((3, 3, conv_dim, conv_dim)),
        "cb_w2": _w_init((3, 3, conv_dim, conv_dim)),
        "trans": make_trans_block_params(trans_dim, head_dim),
    }


def make_scunet_params(in_nc, config, dim, head_dim=32):
    def level(cd, td, n):
        return [make_ctb_params(cd, td, head_dim, "W" if not i % 2 else "SW")
                for i in range(n)]
    return {
        "head_w": _w_init((3, 3, in_nc, dim)),
        "down1": level(dim // 2, dim // 2, config[0]),
        "down1_conv": _w_init((2, 2, dim, 2 * dim)),
        "down2": level(dim, dim, config[1]),
        "down2_conv": _w_init((2, 2, 2 * dim, 4 * dim)),
        "down3": level(2 * dim, 2 * dim, config[2]),
        "down3_conv": _w_init((2, 2, 4 * dim, 8 * dim)),
        "body": level(4 * dim, 4 * dim, config[3]),
        "up3_conv": _w_init((8 * dim, 2, 2, 4 * dim)),
        "up3": level(2 * dim, 2 * dim, config[4]),
        "up2_conv": _w_init((4 * dim, 2, 2, 2 * dim)),
        "up2": level(dim, dim, config[5]),
        "up1_conv": _w_init((2 * dim, 2, 2, dim)),
        "up1": level(dim // 2, dim // 2, config[6]),
        "tail_w": _w_init((3, 3, dim, in_nc)),
    }


# ----------------------------------------------------------------------------
# SCUNet forward (NHWC) and the ONNX-style wrapper
# ----------------------------------------------------------------------------
def scunet_forward(x, p, dim, window_size=8, head_dim=32, input_resolution=256):
    b, h, w, _ = x.shape
    h_pad = (h + 63) // 64 * 64 - h
    w_pad = (w + 63) // 64 * 64 - w
    x0 = jnp.pad(x, ((0, 0), (0, h_pad), (0, w_pad), (0, 0)), mode="reflect")

    x1 = pallas_conv3x3(x0, p["head_w"])

    t = x1
    for bp in p["down1"]:
        t = conv_trans_block_forward(t, bp, dim // 2, dim // 2, head_dim,
                                     window_size, input_resolution)
    x2 = conv2x2_down(t, p["down1_conv"])

    t = x2
    for bp in p["down2"]:
        t = conv_trans_block_forward(t, bp, dim, dim, head_dim,
                                     window_size, input_resolution // 2)
    x3 = conv2x2_down(t, p["down2_conv"])

    t = x3
    for bp in p["down3"]:
        t = conv_trans_block_forward(t, bp, 2 * dim, 2 * dim, head_dim,
                                     window_size, input_resolution // 4)
    x4 = conv2x2_down(t, p["down3_conv"])

    t = x4
    for bp in p["body"]:
        t = conv_trans_block_forward(t, bp, 4 * dim, 4 * dim, head_dim,
                                     window_size, input_resolution // 8)

    t = convT2x2_up(t + x4, p["up3_conv"])
    for bp in p["up3"]:
        t = conv_trans_block_forward(t, bp, 2 * dim, 2 * dim, head_dim,
                                     window_size, input_resolution // 4)

    t = convT2x2_up(t + x3, p["up2_conv"])
    for bp in p["up2"]:
        t = conv_trans_block_forward(t, bp, dim, dim, head_dim,
                                     window_size, input_resolution // 2)

    t = convT2x2_up(t + x2, p["up1_conv"])
    for bp in p["up1"]:
        t = conv_trans_block_forward(t, bp, dim // 2, dim // 2, head_dim,
                                     window_size, input_resolution)

    t = pallas_conv3x3(t + x1, p["tail_w"])
    return t[:, :h, :w, :]


def scunet_wrapper_forward(x_nchw, params, dim, input_resolution=256):
    x = x_nchw.astype(jnp.float32)
    x = pallas_elementwise(x, "prescale")            # where(x>1, x/255, x)
    x = jnp.transpose(x, (0, 2, 3, 1))               # NCHW -> NHWC
    y = scunet_forward(x, params, dim, input_resolution=input_resolution)
    y = jnp.transpose(y, (0, 3, 1, 2))               # NHWC -> NCHW
    y = pallas_elementwise(y, "clamp")                # clamp(0, 1)
    return y


# ----------------------------------------------------------------------------
if __name__ == "__main__":
    # Small but shape-consistent configuration: SCUNet pads spatial dims up to
    # multiples of 64 internally; head_dim=32 forces dim>=64.  config chosen so
    # both 'W' and 'SW' (shifted) attention blocks are exercised.
    in_nc = 3
    dim = 64
    config = [2, 1, 1, 1, 1, 1, 1]
    input_resolution = 256

    params = make_scunet_params(in_nc, config, dim)

    key = jax.random.PRNGKey(0)
    x = jax.random.uniform(key, (1, in_nc, 48, 48), dtype=jnp.float32)

    out = scunet_wrapper_forward(x, params, dim, input_resolution)
    out = jax.block_until_ready(out)

    assert out.shape == (1, in_nc, 48, 48), out.shape
    assert bool(jnp.all(jnp.isfinite(out)))
    assert bool(jnp.all(out >= 0.0)) and bool(jnp.all(out <= 1.0))
    print("KERNEL_OK")
</pallas_src>

<mosaic_0001>
module attributes {stable_mosaic.version = 11 : i64} {
  func.func @kernel(%arg0: i32, %arg1: memref<8x1024xf32, #tpu.memory_space<vmem>>, %arg2: memref<8x1024xf32, #tpu.memory_space<vmem>>) attributes {dimension_semantics = [#tpu.dimension_semantics<parallel>], iteration_bounds = array<i64: 1>, scalar_prefetch = 0 : i64, scratch_operands = 0 : i64, tpu.core_type = #tpu.core_type<tc>, window_params = [{transform_indices = @transform_0, window_bounds = array<i64: 8, 1024>}, {transform_indices = @transform_1, window_bounds = array<i64: 8, 1024>}]} {
    %c0 = arith.constant 0 : index
    %c0_0 = arith.constant 0 : index
    %0 = vector.load %arg1[%c0, %c0_0] : memref<8x1024xf32, #tpu.memory_space<vmem>>, vector<8x1024xf32>
    %cst = arith.constant 1.000000e+00 : f32
    %1 = vector.broadcast %cst : f32 to vector<8x1024xf32>
    %2 = arith.cmpf ogt, %0, %1 : vector<8x1024xf32>
    %cst_1 = arith.constant 0.00392156886 : f32
    %3 = vector.broadcast %cst_1 : f32 to vector<8x1024xf32>
    %4 = arith.mulf %0, %3 : vector<8x1024xf32>
    %5 = arith.select %2, %4, %0 : vector<8x1024xi1>, vector<8x1024xf32>
    %c0_2 = arith.constant 0 : index
    %c0_3 = arith.constant 0 : index
    %6 = vector.load %arg2[%c0_2, %c0_3] : memref<8x1024xf32, #tpu.memory_space<vmem>>, vector<8x1024xf32>
    tpu.vector_store %arg2[%c0_2, %c0_3], %5 {strides = array<i32>} : memref<8x1024xf32, #tpu.memory_space<vmem>>, vector<8x1024xf32>,
    return
  }
  func.func @transform_0(%arg0: i32) -> (i32, i32) {
    %c0_i32 = arith.constant 0 : i32
    %c0_i32_0 = arith.constant 0 : i32
    return %arg0, %c0_i32 : i32, i32
  }
  func.func @transform_1(%arg0: i32) -> (i32, i32) {
    %c0_i32 = arith.constant 0 : i32
    %c0_i32_0 = arith.constant 0 : i32
    return %arg0, %c0_i32 : i32, i32
  }
}

</mosaic_0001>

<bundles_post_ra>
// kernel: pallas_elementwise.1
= control target key start
LH: loop header
LB: loop body
LE: loop exit
PB: predicated region body
PF: predicated region fallthrough
CT: control target
= control target key end

     0   :  { %s110_s0 = inlined_call_operand.vmem [shape: f32[8,1024], index: 0, kind: input, shape index: {}]   ;;  %s111_s1 = inlined_call_operand.vmem [shape: f32[8,1024], index: 1, kind: output, shape index: {}]  }
   0x1   :  { %v8_v0 = vld [vmem:[%s110_s0] sm:$0xff]  ;;  %v9_v1 = vld [vmem:[%s110_s0 + $0x8] sm:$0xff]  ;;  %v10_v2 = vld [vmem:[%s110_s0 + $0x10] sm:$0xff] }
   0x2   :  { %vm16_vm0 = vcmp.gt.f32.partialorder %v8_v0, 1.0  ;;  %v24_v3 = vmul.f32 0.003921569, %v8_v0  ;;  %vm17_vm1 = vcmp.gt.f32.partialorder %v9_v1, 1.0  ;;  %v25_v4 = vmul.f32 0.003921569, %v9_v1 }
   0x3   :  { %vm18_vm2 = vcmp.gt.f32.partialorder %v10_v2, 1.0  ;;  %v26_v5 = vmul.f32 0.003921569, %v10_v2  ;;  %v11_v6 = vld [vmem:[%s110_s0 + $0x18] sm:$0xff]  ;;  %v12_v7 = vld [vmem:[%s110_s0 + $0x20] sm:$0xff]  ;;  %v13_v8 = vld [vmem:[%s110_s0 + $0x28] sm:$0xff] }
   0x4   :  { %v32_v9 = vsel %vm16_vm0, %v24_v3, %v8_v0  ;;  %v33_v10 = vsel %vm17_vm1, %v25_v4, %v9_v1  ;;  %vm19_vm3 = vcmp.gt.f32.partialorder %v11_v6, 1.0  ;;  %v27_v11 = vmul.f32 0.003921569, %v11_v6  ;;  %v14_v12 = vld [vmem:[%s110_s0 + $0x30] sm:$0xff]  ;;  %v15_v13 = vld [vmem:[%s110_s0 + $0x38] sm:$0xff] }
   0x5   :  { %40 = vst [vmem:[%s111_s1] sm:$0xff] %v32_v9  ;;  %v34_v14 = vsel %vm18_vm2, %v26_v5, %v10_v2  ;;  %vm20_vm4 = vcmp.gt.f32.partialorder %v12_v7, 1.0  ;;  %v28_v15 = vmul.f32 0.003921569, %v12_v7  ;;  %vm21_vm5 = vcmp.gt.f32.partialorder %v13_v8, 1.0 }
   0x6   :  { %41 = vst [vmem:[%s111_s1 + $0x8] sm:$0xff] %v33_v10  ;;  %v35_v16 = vsel %vm19_vm3, %v27_v11, %v11_v6  ;;  %v29_v17 = vmul.f32 0.003921569, %v13_v8  ;;  %vm22_vm6 = vcmp.gt.f32.partialorder %v14_v12, 1.0  ;;  %v30_v18 = vmul.f32 0.003921569, %v14_v12 }
   0x7   :  { %42 = vst [vmem:[%s111_s1 + $0x10] sm:$0xff] %v34_v14  ;;  %v36_v19 = vsel %vm20_vm4, %v28_v15, %v12_v7  ;;  %vm23_vm7 = vcmp.gt.f32.partialorder %v15_v13, 1.0  ;;  %v31_v20 = vmul.f32 0.003921569, %v15_v13 }
   0x8   :  { %43 = vst [vmem:[%s111_s1 + $0x18] sm:$0xff] %v35_v16  ;;  %v37_v21 = vsel %vm21_vm5, %v29_v17, %v13_v8  ;;  %v38_v22 = vsel %vm22_vm6, %v30_v18, %v14_v12 }
   0x9   :  { %44 = vst [vmem:[%s111_s1 + $0x20] sm:$0xff] %v36_v19  ;;  %v39_v23 = vsel %vm23_vm7, %v31_v20, %v15_v13 }
   0xa   :  { %45 = vst [vmem:[%s111_s1 + $0x28] sm:$0xff] %v37_v21 }
   0xb   :  { %46 = vst [vmem:[%s111_s1 + $0x30] sm:$0xff] %v38_v22 }
   0xc   :  { %47 = vst [vmem:[%s111_s1 + $0x38] sm:$0xff] %v39_v23 }

</bundles_post_ra>
